<compile_context>
chip_gen: v7x
topology: tpu7x:2x2x1
jax: 0.10.0
libtpu: 0.0.40
codegen_flags: <defaults>
</compile_context>

<pallas_src>
import jax
import jax.numpy as jnp
from jax.experimental import pallas as pl
from jax.experimental.pallas import tpu as pltpu

# ---- module hyper-parameters (small but TPU-tile friendly) -------------------
BATCH       = 8
INPUT_SIZE  = 32
RANK        = 256          # must be divisible by WINDOW_SIZE
WINDOW_SIZE = 128          # == hidden_size so fc (Linear(hidden, output)) applies
HIDDEN_SIZE = 128
OUTPUT_SIZE = 128
EPS         = 1e-12        # F.normalize default eps


def fbp_kernel(x12_ref, wbd_ref, fcw_ref, fcb_ref, o_ref):
    # Fused U/V projection: [x1 | x2] @ [[U,0],[0,V]] = [x1@U | x2@V].
    proj = jnp.dot(x12_ref[...], wbd_ref[...],
                   preferred_element_type=jnp.float32)                 # (TB, 2*RANK)

    # Elementwise bilinear interaction (lane-aligned static slices).
    a = proj[:, 0:RANK]
    b = proj[:, RANK:2 * RANK]
    inter = a * b                                                       # (TB, RANK)

    # view(B, RANK // W, W).sum(dim=-2): sum consecutive 128-wide chunks.
    n_chunks = RANK // WINDOW_SIZE
    pooled = inter[:, 0:WINDOW_SIZE]
    for c in range(1, n_chunks):
        pooled = pooled + inter[:, c * WINDOW_SIZE:(c + 1) * WINDOW_SIZE]  # (TB, W)

    # F.normalize(p=2, dim=-1): x / max(||x||_2, eps)
    #   == x * rsqrt(max(sum(x^2), eps^2))   (one EUP rsqrt, no per-lane divide)
    sumsq = jnp.sum(pooled * pooled, axis=-1, keepdims=True)
    inv = jax.lax.rsqrt(jnp.maximum(sumsq, EPS * EPS))
    pooled = pooled * inv

    # fc: Linear(hidden_size, output_size) with bias.
    out = jnp.dot(pooled, fcw_ref[...], preferred_element_type=jnp.float32)
    out = out + fcb_ref[...]                                            # broadcast (1, OUT)
    o_ref[...] = out.astype(o_ref.dtype)


def _pick_tb(batch, max_tb=256):
    """Pick a batch tile: multiple of 8, <= max_tb, and >= 2 grid steps when
    the batch allows it (keeps both v7x TensorCores busy for real workloads)."""
    cap = min(batch // 2, max_tb)
    cap -= cap % 8
    for tb in range(cap, 7, -8):
        if batch % tb == 0:
            return tb
    return batch  # tiny batch: single grid step


def make_block_diag(u_w, v_w):
    """Build [[U, 0], [0, V]] once at parameter-prep time (outside the kernel)."""
    in_sz, r = u_w.shape
    w = jnp.zeros((2 * in_sz, 2 * r), dtype=u_w.dtype)
    w = w.at[:in_sz, :r].set(u_w)
    w = w.at[in_sz:, r:].set(v_w)
    return w


def factorized_bilinear_pooling(x1, x2, w_bd, fc_w, fc_b):
    """x1, x2: (B, INPUT_SIZE). w_bd: (2*INPUT_SIZE, 2*RANK) block-diag of U/V.
    fc_w: (HIDDEN_SIZE, OUTPUT_SIZE) pre-transposed. fc_b: (1, OUTPUT_SIZE)."""
    B = x1.shape[0]
    TB = _pick_tb(B)

    # Concatenate activations once so the kernel does a single fused matmul.
    x12 = jnp.concatenate([x1, x2], axis=-1)                 # (B, 2*INPUT_SIZE)

    return pl.pallas_call(
        fbp_kernel,
        out_shape=jax.ShapeDtypeStruct((B, OUTPUT_SIZE), jnp.float32),
        grid=(B // TB,),
        in_specs=[
            pl.BlockSpec((TB, 2 * INPUT_SIZE),           lambda i: (i, 0)),
            # Weight/bias block indices are grid-invariant -> Pallas keeps them
            # resident in VMEM (no re-DMA per grid step).
            pl.BlockSpec((2 * INPUT_SIZE, 2 * RANK),     lambda i: (0, 0)),
            pl.BlockSpec((HIDDEN_SIZE, OUTPUT_SIZE),     lambda i: (0, 0)),
            pl.BlockSpec((1, OUTPUT_SIZE),               lambda i: (0, 0)),
        ],
        out_specs=pl.BlockSpec((TB, OUTPUT_SIZE), lambda i: (i, 0)),
        compiler_params=pltpu.CompilerParams(dimension_semantics=("parallel",)),
    )(x12, w_bd, fc_w, fc_b)


def reference_forward(x1, x2, u_w, v_w, fc_w, fc_b):
    a = x1 @ u_w
    b = x2 @ v_w
    inter = a * b
    pooled = inter.reshape(x1.shape[0], RANK // WINDOW_SIZE, WINDOW_SIZE).sum(axis=-2)
    norm = jnp.sqrt(jnp.sum(pooled * pooled, axis=-1, keepdims=True))
    pooled = pooled / jnp.maximum(norm, EPS)
    return pooled @ fc_w + fc_b


if __name__ == "__main__":
    key = jax.random.PRNGKey(0)
    k1, k2, k3, k4, k5, k6 = jax.random.split(key, 6)

    # deterministic synthetic inputs & parameters
    x1 = jax.random.normal(k1, (BATCH, INPUT_SIZE), dtype=jnp.float32)
    x2 = jax.random.normal(k2, (BATCH, INPUT_SIZE), dtype=jnp.float32)

    # Linear weights, stored transposed as (in, out).
    u_w  = jax.random.normal(k3, (INPUT_SIZE, RANK), dtype=jnp.float32) * 0.05
    v_w  = jax.random.normal(k4, (INPUT_SIZE, RANK), dtype=jnp.float32) * 0.05
    fc_w = jax.random.normal(k5, (HIDDEN_SIZE, OUTPUT_SIZE), dtype=jnp.float32) * 0.05
    fc_b = jax.random.normal(k6, (1, OUTPUT_SIZE), dtype=jnp.float32) * 0.05

    # One-time parameter prep: block-diagonal fused projection weight.
    w_bd = make_block_diag(u_w, v_w)

    out = factorized_bilinear_pooling(x1, x2, w_bd, fc_w, fc_b)
    out = jax.block_until_ready(out)

    ref = reference_forward(x1, x2, u_w, v_w, fc_w, fc_b)
    assert out.shape == (BATCH, OUTPUT_SIZE)
    assert jnp.allclose(out, ref, atol=1e-4, rtol=1e-4)

    print("KERNEL_OK")
</pallas_src>

<mosaic_0001>
module attributes {stable_mosaic.version = 11 : i64} {
  func.func @fbp_kernel(%arg0: i32, %arg1: memref<8x64xf32, #tpu.memory_space<vmem>>, %arg2: memref<64x512xf32, #tpu.memory_space<vmem>>, %arg3: memref<128x128xf32, #tpu.memory_space<vmem>>, %arg4: memref<1x128xf32, #tpu.memory_space<vmem>>, %arg5: memref<8x128xf32, #tpu.memory_space<vmem>>) attributes {dimension_semantics = [#tpu.dimension_semantics<parallel>], iteration_bounds = array<i64: 1>, scalar_prefetch = 0 : i64, scratch_operands = 0 : i64, tpu.core_type = #tpu.core_type<tc>, window_params = [{transform_indices = @transform_0, window_bounds = array<i64: 8, 64>}, {pipeline_mode = #tpu.pipeline_mode<synchronous>, transform_indices = @transform_1, window_bounds = array<i64: 64, 512>}, {pipeline_mode = #tpu.pipeline_mode<synchronous>, transform_indices = @transform_2, window_bounds = array<i64: 128, 128>}, {pipeline_mode = #tpu.pipeline_mode<synchronous>, transform_indices = @transform_3, window_bounds = array<i64: 1, 128>}, {transform_indices = @transform_4, window_bounds = array<i64: 8, 128>}]} {
    %c0 = arith.constant 0 : index
    %c0_0 = arith.constant 0 : index
    %0 = vector.load %arg1[%c0, %c0_0] : memref<8x64xf32, #tpu.memory_space<vmem>>, vector<8x64xf32>
    %c0_1 = arith.constant 0 : index
    %c0_2 = arith.constant 0 : index
    %1 = vector.load %arg2[%c0_1, %c0_2] : memref<64x512xf32, #tpu.memory_space<vmem>>, vector<64x512xf32>
    %cst = arith.constant dense<0.000000e+00> : vector<8x512xf32>
    %2 = tpu.matmul %0, %1, %cst {dimension_numbers = #tpu.dot_dimension_numbers<[1], [0], [0], [1], [0, 0, 1, 1], [], []>} : vector<8x64xf32>, vector<64x512xf32>, vector<8x512xf32> -> vector<8x512xf32>
    %3 = vector.extract_strided_slice %2 {offsets = [0, 0], sizes = [8, 256], strides = [1, 1]} : vector<8x512xf32> to vector<8x256xf32>
    %4 = vector.extract_strided_slice %2 {offsets = [0, 256], sizes = [8, 256], strides = [1, 1]} : vector<8x512xf32> to vector<8x256xf32>
    %5 = arith.mulf %3, %4 : vector<8x256xf32>
    %6 = vector.extract_strided_slice %5 {offsets = [0, 0], sizes = [8, 128], strides = [1, 1]} : vector<8x256xf32> to vector<8x128xf32>
    %7 = vector.extract_strided_slice %5 {offsets = [0, 128], sizes = [8, 128], strides = [1, 1]} : vector<8x256xf32> to vector<8x128xf32>
    %8 = arith.addf %6, %7 : vector<8x128xf32>
    %9 = arith.mulf %8, %8 : vector<8x128xf32>
    %cst_3 = arith.constant dense<0.000000e+00> : vector<8xf32>
    %10 = vector.multi_reduction <add>, %9, %cst_3 [1] : vector<8x128xf32> to vector<8xf32>
    %11 = vector.shape_cast %10 : vector<8xf32> to vector<8x1xf32>
    %cst_4 = arith.constant 1.000000e-24 : f32
    %12 = vector.broadcast %cst_4 : f32 to vector<8x1xf32>
    %13 = arith.maximumf %11, %12 : vector<8x1xf32>
    %14 = math.rsqrt %13 : vector<8x1xf32>
    %15 = vector.broadcast %14 : vector<8x1xf32> to vector<8x128xf32>
    %16 = arith.mulf %8, %15 : vector<8x128xf32>
    %c0_5 = arith.constant 0 : index
    %c0_6 = arith.constant 0 : index
    %17 = vector.load %arg3[%c0_5, %c0_6] : memref<128x128xf32, #tpu.memory_space<vmem>>, vector<128x128xf32>
    %cst_7 = arith.constant dense<0.000000e+00> : vector<8x128xf32>
    %18 = tpu.matmul %16, %17, %cst_7 {dimension_numbers = #tpu.dot_dimension_numbers<[1], [0], [0], [1], [0, 0, 1, 1], [], []>} : vector<8x128xf32>, vector<128x128xf32>, vector<8x128xf32> -> vector<8x128xf32>
    %c0_8 = arith.constant 0 : index
    %c0_9 = arith.constant 0 : index
    %19 = vector.load %arg4[%c0_8, %c0_9] : memref<1x128xf32, #tpu.memory_space<vmem>>, vector<1x128xf32>
    %20 = vector.broadcast %19 : vector<1x128xf32> to vector<8x128xf32>
    %21 = arith.addf %18, %20 : vector<8x128xf32>
    %c0_10 = arith.constant 0 : index
    %c0_11 = arith.constant 0 : index
    %22 = vector.load %arg5[%c0_10, %c0_11] : memref<8x128xf32, #tpu.memory_space<vmem>>, vector<8x128xf32>
    tpu.vector_store %arg5[%c0_10, %c0_11], %21 {strides = array<i32>} : memref<8x128xf32, #tpu.memory_space<vmem>>, vector<8x128xf32>,
    return
  }
  func.func @transform_0(%arg0: i32) -> (i32, i32) {
    %c0_i32 = arith.constant 0 : i32
    %c0_i32_0 = arith.constant 0 : i32
    return %arg0, %c0_i32 : i32, i32
  }
  func.func @transform_1(%arg0: i32) -> (i32, i32) {
    %c0_i32 = arith.constant 0 : i32
    %c0_i32_0 = arith.constant 0 : i32
    %c0_i32_1 = arith.constant 0 : i32
    return %c0_i32, %c0_i32_0 : i32, i32
  }
  func.func @transform_2(%arg0: i32) -> (i32, i32) {
    %c0_i32 = arith.constant 0 : i32
    %c0_i32_0 = arith.constant 0 : i32
    %c0_i32_1 = arith.constant 0 : i32
    return %c0_i32, %c0_i32_0 : i32, i32
  }
  func.func @transform_3(%arg0: i32) -> (i32, i32) {
    %c0_i32 = arith.constant 0 : i32
    %c0_i32_0 = arith.constant 0 : i32
    %c0_i32_1 = arith.constant 0 : i32
    return %c0_i32, %c0_i32_0 : i32, i32
  }
  func.func @transform_4(%arg0: i32) -> (i32, i32) {
    %c0_i32 = arith.constant 0 : i32
    %c0_i32_0 = arith.constant 0 : i32
    return %arg0, %c0_i32 : i32, i32
  }
}

</mosaic_0001>

<bundles_post_ra>
// kernel: tpu_custom_call.1
= control target key start
LH: loop header
LB: loop body
LE: loop exit
PB: predicated region body
PF: predicated region fallthrough
CT: control target
= control target key end

     0   :  { %9 = vsyncpa [#allocation3], 0  ;;  %s665_s0 = inlined_call_operand.hbm [shape: f32[8,64], index: 0, kind: input, shape index: {}]   ;;  %s666_s1 = inlined_call_operand.hbm [shape: f32[64,512], index: 1, kind: input, shape index: {}]   ;;  %s667_s2 = inlined_call_operand.hbm [shape: f32[128,128], index: 2, kind: input, shape index: {}]   ;;  %s668_s3 = inlined_call_operand.vmem [shape: f32[1,128], index: 3, kind: input, shape index: {}]   ;;  %s669_s4 = inlined_call_operand.hbm [shape: f32[8,128], index: 4, kind: output, shape index: {}]  }
   0x1   :  { %10 = vsyncpa [#allocation6], 0 }
   0x2   :  { %11 = vsyncpa [#allocation4], 0  ;;  %s573_s15 = smov [#allocation5]   ;;  %s479_s19 = scalar_lea.hbm %s666_s1, 4096 }
   0x3   :  { %s27_s16 = sshll.u32 %s573_s15, 4  ;;  %p480_p0 = scmp.ne.s32.totalorder %s666_s1, %s479_s19  ;;  %s28_s16 = int_to_ptr.vmem [resolvable:$true] %s27_s16 }
   0x4   :  { %p483_p1 = scmp.lt.u32.totalorder %s479_s19, %s666_s1 }
   0x6   :  { %p485_p2 = pnand %p483_p1, %p480_p0 }
   0x8   :  { %488 = shalt.err (!%p485_p2)
}
   0x9   :  { %s489_s24 = scalar_lea.vmem %s28_s16, 4096  ;;  %p494_p4 = scmp.lt.s32.totalorder %s28_s16, %s28_s16 }
   0xa   :  { %p490_p3 = scmp.ne.s32.totalorder %s28_s16, %s489_s24  ;;  %p495_p5 = scmp.lt.s32.totalorder %s489_s24, %s489_s24 }
   0xc   :  { %p496_p6 = por %p495_p5, %p494_p4 }
   0xe   :  { %p497_p7 = pnand %p496_p6, %p490_p3 }
  0x10   :  { %500 = shalt.err (!%p497_p7)
}
  0x11   :  { %s574_s25 = smov 512   ;;  %s575_s26 = smov 32  }
  0x12   :  { %33 = dma.hbm_to_vmem [thread:$0]  %s666_s1, 4096, %s28_s16, [#allocation6], %s574_s25, %s574_s25, %s575_s26  }
  0x13   :  { %s576_s29 = smov [#allocation2]   ;;  %s577_s5 = smov [#allocation7]  }
  0x14   :  { %s18_s30 = sshll.u32 %s576_s29, 4  ;;  %s39_s6 = sshll.u32 %s577_s5, 4  ;;  %s19_s30 = int_to_ptr.vmem [resolvable:$true] %s18_s30  ;;  %s40_s6 = int_to_ptr.vmem [resolvable:$true] %s39_s6 }
  0x15   :  { %s501_s9 = scalar_lea.hbm %s665_s0, 128 }
  0x16   :  { %p502_p8 = scmp.ne.s32.totalorder %s665_s0, %s501_s9  ;;  %p505_p9 = scmp.lt.u32.totalorder %s501_s9, %s665_s0 }
  0x18   :  { %p507_p10 = pnand %p505_p9, %p502_p8 }
  0x1a   :  { %510 = shalt.err (!%p507_p10)
}
  0x1b   :  { %s511_s1 = scalar_lea.vmem %s19_s30, 128  ;;  %p516_p12 = scmp.lt.s32.totalorder %s19_s30, %s19_s30 }
  0x1c   :  { %p512_p11 = scmp.ne.s32.totalorder %s19_s30, %s511_s1  ;;  %p517_p13 = scmp.lt.s32.totalorder %s511_s1, %s511_s1 }
  0x1e   :  { %p518_p0 = por %p517_p13, %p516_p12 }
  0x20   :  { %p519_p1 = pnand %p518_p0, %p512_p11 }
  0x22   :  { %522 = shalt.err (!%p519_p1)
}
  0x23   :  { %21 = dma.hbm_to_vmem [thread:$0]  %s665_s0, 128, %s19_s30, [#allocation3]  }
  0x24   :  { %s523_s18 = scalar_lea.hbm %s667_s2, 2048 }
  0x25   :  { %p524_p2 = scmp.ne.s32.totalorder %s667_s2, %s523_s18  ;;  %p527_p3 = scmp.lt.u32.totalorder %s523_s18, %s667_s2 }
  0x27   :  { %p529_p4 = pnand %p527_p3, %p524_p2 }
  0x29   :  { %532 = shalt.err (!%p529_p4)
}
  0x2a   :  { %s533_s23 = scalar_lea.vmem %s40_s6, 2048  ;;  %p538_p6 = scmp.lt.s32.totalorder %s40_s6, %s40_s6 }
  0x2b   :  { %p534_p5 = scmp.ne.s32.totalorder %s40_s6, %s533_s23  ;;  %p539_p7 = scmp.lt.s32.totalorder %s533_s23, %s533_s23 }
  0x2d   :  { %p540_p8 = por %p539_p7, %p538_p6 }
  0x2f   :  { %p541_p9 = pnand %p540_p8, %p534_p5 }
  0x31   :  { %544 = shalt.err (!%p541_p9)
}
  0x32   :  { %s578_s0 = smov 128   ;;  %s579_s24 = smov 8  }
  0x33   :  { %45 = dma.hbm_to_vmem [thread:$0]  %s667_s2, 2048, %s40_s6, [#allocation6], %s578_s0, %s578_s0, %s579_s24  }
  0x34   :  { %567 = dma.done.wait [#allocation3], 128  }
  0x35   :  { %568 = vsyncadd [#allocation3], 4294967168 }
  0x36   :  { %569 = dma.done.wait [#allocation6], 6144  }
  0x37   :  { %570 = vsyncadd [#allocation6], 4294961152  ;;  %v580_v0 = vmov 0.0   ;;  %v59_v1 = vld [vmem:[#allocation5 + $0x8] sm:$0xff]  ;;  %v58_v3 = vld [vmem:[#allocation5] sm:$0xff]  ;;  %vm90_vm0 = vcmask 523264  }
  0x38   :  { %158 = vmatprep.mubr.f32.mxu1 %v580_v0  ;;  %v63_v2 = vld [vmem:[#allocation5 + $0x28] sm:$0xff]  ;;  %v62_v5 = vld [vmem:[#allocation5 + $0x20] sm:$0xff]  ;;  %v61_v24 = vld [vmem:[#allocation5 + $0x18] sm:$0xff]  ;;  %v581_v53 = vmov 0.0|0.0   ;;  %vm582_vm1 = vmmov 0   ;;  %s583_s28 = smov [#allocation8]  }
  0x39   :  { %v410_v4 = vpack.c.bf16 %v63_v2, %v59_v1  ;;  %v67_v6 = vld [vmem:[#allocation5 + $0x48] sm:$0xff]  ;;  %v412_v8 = vpack.c.bf16 %v62_v5, %v58_v3  ;;  %v66_v10 = vld [vmem:[#allocation5 + $0x40] sm:$0xff]  ;;  %v65_v25 = vld [vmem:[#allocation5 + $0x38] sm:$0xff]  ;;  %442 = vmatprep.subr.bf16.mxu0 %v581_v53  ;;  %407 = vmatprep.mubr.msk.f32.mxu0 %vm582_vm1, %v580_v0  ;;  %s345_s29 = sshll.u32 %s583_s28, 4  ;;  %s346_s29 = int_to_ptr.vmem [resolvable:$true] %s345_s29 }
  0x3a   :  { %v71_v7 = vld [vmem:[#allocation5 + $0x68] sm:$0xff]  ;;  %v70_v11 = vld [vmem:[#allocation5 + $0x60] sm:$0xff]  ;;  %v426_v27 = vpack.c.bf16 %v65_v25, %v61_v24  ;;  %v60_v28 = vld [vmem:[#allocation5 + $0x10] sm:$0xff]  ;;  %s545_s30 = scalar_lea.vmem %s346_s29, 128  ;;  %p550_p11 = scmp.lt.s32.totalorder %s346_s29, %s346_s29 }
  0x3b   :  { %v414_v9 = vpack.c.bf16 %v71_v7, %v67_v6  ;;  %v75_v12 = vld [vmem:[#allocation5 + $0x88] sm:$0xff]  ;;  %411 = vmatprep.subr.bf16.mxu1 %v410_v4  ;;  %v416_v14 = vpack.c.bf16 %v70_v11, %v66_v10  ;;  %v74_v16 = vld [vmem:[#allocation5 + $0x80] sm:$0xff]  ;;  %v64_v29 = vld [vmem:[#allocation5 + $0x30] sm:$0xff]  ;;  %p546_p10 = scmp.ne.s32.totalorder %s346_s29, %s545_s30  ;;  %p551_p12 = scmp.lt.s32.totalorder %s545_s30, %s545_s30 }
  0x3c   :  { %v79_v13 = vld [vmem:[#allocation5 + $0xa8] sm:$0xff]  ;;  %413 = vmatpush1.bf16.msra.mxu1 %v412_v8  ;;  %v78_v17 = vld [vmem:[#allocation5 + $0xa0] sm:$0xff]  ;;  %v69_v30 = vld [vmem:[#allocation5 + $0x58] sm:$0xff]  ;;  %v428_v33 = vpack.c.bf16 %v64_v29, %v60_v28 }
  0x3d   :  { %415 = vmatprep.subr.bf16.mxu1 %v414_v9  ;;  %v418_v15 = vpack.c.bf16 %v79_v13, %v75_v12  ;;  %v83_v18 = vld [vmem:[#allocation5 + $0xc8] sm:$0xff]  ;;  %v420_v20 = vpack.c.bf16 %v78_v17, %v74_v16  ;;  %v82_v22 = vld [vmem:[#allocation5 + $0xc0] sm:$0xff]  ;;  %v73_v31 = vld [vmem:[#allocation5 + $0x78] sm:$0xff]  ;;  %p552_p13 = por %p551_p12, %p550_p11 }
  0x3e   :  { %v87_v19 = vld [vmem:[#allocation5 + $0xe8] sm:$0xff]  ;;  %v86_v23 = vld [vmem:[#allocation5 + $0xe0] sm:$0xff]  ;;  %v57_v32 = vld [vmem:[#allocation2] sm:$0xff]  ;;  %v430_v34 = vpack.c.bf16 %v73_v31, %v69_v30 }
  0x3f   :  { %v422_v21 = vpack.c.bf16 %v87_v19, %v83_v18  ;;  %v424_v26 = vpack.c.bf16 %v86_v23, %v82_v22  ;;  %v68_v35 = vld [vmem:[#allocation5 + $0x50] sm:$0xff]  ;;  %v77_v37 = vld [vmem:[#allocation5 + $0x98] sm:$0xff]  ;;  %v245_v50 = vld [vmem:[#allocation7] sm:$0xff]  ;;  %p553_p0 = pnand %p552_p13, %p546_p10 }
  0x40   :  { %417 = vmatpush1.bf16.msra.mxu1 %v416_v14  ;;  %v72_v36 = vld [vmem:[#allocation5 + $0x70] sm:$0xff]  ;;  %v81_v38 = vld [vmem:[#allocation5 + $0xb8] sm:$0xff]  ;;  %v246_v51 = vld [vmem:[#allocation7 + $0x8] sm:$0xff] }
  0x41   :  { %419 = vmatprep.subr.bf16.mxu1 %v418_v15  ;;  %v432_v39 = vpack.c.bf16 %v72_v36, %v68_v35  ;;  %v434_v40 = vpack.c.bf16 %v81_v38, %v77_v37  ;;  %v76_v41 = vld [vmem:[#allocation5 + $0x90] sm:$0xff]  ;;  %v85_v43 = vld [vmem:[#allocation5 + $0xd8] sm:$0xff]  ;;  %v443_v54 = vpack.c.bf16 %v246_v51, %v245_v50  ;;  %v249_v57 = vld [vmem:[#allocation7 + $0x20] sm:$0xff] }
  0x42   :  { %v80_v42 = vld [vmem:[#allocation5 + $0xb0] sm:$0xff]  ;;  %v89_v44 = vld [vmem:[#allocation5 + $0xf8] sm:$0xff]  ;;  %v250_v58 = vld [vmem:[#allocation7 + $0x28] sm:$0xff] }
  0x43   :  { %v436_v45 = vpack.c.bf16 %v80_v42, %v76_v41  ;;  %v438_v46 = vpack.c.bf16 %v89_v44, %v85_v43  ;;  %v84_v47 = vld [vmem:[#allocation5 + $0xd0] sm:$0xff]  ;;  %v248_v55 = vld [vmem:[#allocation7 + $0x18] sm:$0xff]  ;;  %444 = vmatpush3.bf16.msra.mxu0 %v443_v54  ;;  %v449_v59 = vpack.c.bf16 %v250_v58, %v249_v57  ;;  %v253_v8 = vld [vmem:[#allocation7 + $0x40] sm:$0xff] }
  0x44   :  { %421 = vmatpush1.bf16.msra.mxu1 %v420_v20  ;;  %v88_v48 = vld [vmem:[#allocation5 + $0xf0] sm:$0xff]  ;;  %445 = vmatprep.subr.bf16.mxu0 %v581_v53  ;;  %v252_v61 = vld [vmem:[#allocation7 + $0x38] sm:$0xff]  ;;  %v254_v9 = vld [vmem:[#allocation7 + $0x48] sm:$0xff] }
  0x45   :  { %423 = vmatprep.subr.bf16.mxu1 %v422_v21  ;;  %v440_v49 = vpack.c.bf16 %v88_v48, %v84_v47  ;;  %v247_v52 = vld [vmem:[#allocation7 + $0x10] sm:$0xff]  ;;  %v455_v10 = vpack.c.bf16 %v254_v9, %v253_v8  ;;  %v256_v12 = vld [vmem:[#allocation7 + $0x58] sm:$0xff]  ;;  %v257_v14 = vld [vmem:[#allocation7 + $0x60] sm:$0xff] }
  0x46   :  { %v446_v56 = vpack.c.bf16 %v248_v55, %v247_v52  ;;  %v251_v60 = vld [vmem:[#allocation7 + $0x30] sm:$0xff]  ;;  %v258_v15 = vld [vmem:[#allocation7 + $0x68] sm:$0xff]  ;;  %v260_v18 = vld [vmem:[#allocation7 + $0x78] sm:$0xff] }
  0x47   :  { %v452_v62 = vpack.c.bf16 %v252_v61, %v251_v60  ;;  %v255_v11 = vld [vmem:[#allocation7 + $0x50] sm:$0xff]  ;;  %v461_v16 = vpack.c.bf16 %v258_v15, %v257_v14  ;;  %v357_v24 = vld [vmem:[%s668_s3] ss:$0 sm:$0xff] }
  0x48   :  { %425 = vmatpush1.bf16.msra.mxu1 %v424_v26  ;;  %447 = vmatpush3.bf16.msra.mxu0 %v446_v56  ;;  %v458_v13 = vpack.c.bf16 %v256_v12, %v255_v11  ;;  %v259_v17 = vld [vmem:[#allocation7 + $0x70] sm:$0xff] }
  0x49   :  { %427 = vmatprep.subr.bf16.mxu1 %v426_v27  ;;  %448 = vmatprep.subr.bf16.mxu0 %v581_v53  ;;  %v464_v19 = vpack.c.bf16 %v260_v18, %v259_v17 }
  0x4b   :  { %355 = vmatmul.mubr.msk.f32.vlgmr.msra.gmra.mrb[0].mxu1 %vm90_vm0, %v57_v32 }
  0x4c   :  { %429 = vmatpush1.bf16.msra.mxu1 %v428_v33  ;;  %229 = vmatprep.mubr.f32.mxu1 %v580_v0 }
  0x4d   :  { %431 = vmatprep.subr.bf16.mxu1 %v430_v34  ;;  %450 = vmatpush3.bf16.msra.mxu0 %v449_v59 }
  0x4e   :  { %451 = vmatprep.subr.bf16.mxu0 %v581_v53 }
  0x50   :  { %433 = vmatpush1.bf16.msra.mxu1 %v432_v39 }
  0x51   :  { %435 = vmatprep.subr.bf16.mxu1 %v434_v40  ;;  %453 = vmatpush3.bf16.msra.mxu0 %v452_v62 }
  0x52   :  { %454 = vmatprep.subr.bf16.mxu0 %v581_v53 }
  0x54   :  { %437 = vmatpush1.bf16.msra.mxu1 %v436_v45 }
  0x55   :  { %439 = vmatprep.subr.bf16.mxu1 %v438_v46  ;;  %456 = vmatpush3.bf16.msra.mxu0 %v455_v10 }
  0x56   :  { %457 = vmatprep.subr.bf16.mxu0 %v581_v53 }
  0x58   :  { %441 = vmatpush1.bf16.msra.mxu1 %v440_v49 }
  0x59   :  { %459 = vmatpush3.bf16.msra.mxu0 %v458_v13 }
  0x5a   :  { %460 = vmatprep.subr.bf16.mxu0 %v581_v53 }
  0x5b   :  { %356 = vmatmul.mubr.msk.f32.vlgmr.msra.gmra.mrb[2].mxu1 %vm90_vm0, %v57_v32 }
  0x5d   :  { %462 = vmatpush3.bf16.msra.mxu0 %v461_v16 }
  0x5e   :  { %463 = vmatprep.subr.bf16.mxu0 %v581_v53 }
  0x61   :  { %465 = vmatpush3.bf16.msra.mxu0 %v464_v19 }
 0x11e   :  { %v160_v63 = vpop.f32.mrb[0].mxu1 }
 0x11f   :  { %v162_v1 = vpop.f32.mrb[1].mxu1 }
 0x12e   :  { %v231_v2 = vpop.f32.mrb[2].mxu1 }
 0x12f   :  { %v236_v3 = vmul.f32 %v231_v2, %v160_v63  ;;  %v233_v4 = vpop.f32.mrb[3].mxu1 }
 0x130   :  { %v237_v5 = vmul.f32 %v233_v4, %v162_v1 }
 0x132   :  { %v238_v6 = vadd.f32 %v237_v5, %v236_v3 }
 0x134   :  { %v239_v7 = vmul.f32 %v238_v6, %v238_v6 }
 0x136   :  { %240 = vadd.xlane.f32.xlu0 %v239_v7 }
 0x1c3   :  { %v241_v20 = vpop.xlane.xlu0 %240 }
 0x1c4   :  { %v242_v21 = vmax.f32 %v241_v20, 1e-24 }
 0x1c6   :  { %477 = vrsqrt.f32 %v242_v21 }
 0x1d0   :  { %v478_v22 = vpop.eup %477 }
 0x1d1   :  { %v244_v23 = vmul.f32 %v478_v22, %v238_v6 }
 0x1d3   :  { %408 = vmatmul.mubr.f32.vlgmr.msra.gmra.mrb[0].mxu0 %v244_v23 }
 0x2a6   :  { %v334_v0 = vpop.f32.mrb[0].mxu0 }
 0x2a7   :  { %v335_v25 = vadd.f32 %v357_v24, %v334_v0  ;;  %v409_v26 = vpop.f32.mrb[1].mxu0 }
 0x2a9   :  { %338 = vst [vmem:[#allocation8] sm:$0xff] %v335_v25 }
 0x2aa   :  { %556 = shalt.err (!%p553_p0)
}
 0x2ab   :  { %s557_s7 = scalar_lea.hbm %s669_s4, 128 }
 0x2ac   :  { %p558_p1 = scmp.ne.s32.totalorder %s669_s4, %s557_s7  ;;  %p561_p2 = scmp.lt.u32.totalorder %s557_s7, %s669_s4 }
 0x2ae   :  { %p563_p3 = pnand %p561_p2, %p558_p1 }
 0x2b0   :  { %566 = shalt.err (!%p563_p3)
}
 0x2b1   :  { %348 = dma.vmem_to_hbm [thread:$0]  %s346_s29, 128, %s669_s4, [#allocation4]  }
 0x2b2   :  { %571 = dma.done.wait [#allocation4], 128  }
 0x2b3   :  { %572 = vsyncadd [#allocation4], 4294967168 }
 0x2b4   :  { %352 = vsyncpa [#allocation3], 1 }
 0x2b5   :  { %353 = vsyncpa [#allocation6], 1 }
 0x2b6   :  { %354 = vsyncpa [#allocation4], 1 }

</bundles_post_ra>
